<compile_context>
chip_gen: v6e
topology: v6e:2x2x1
jax: 0.10.0
libtpu: 0.0.40
codegen_flags: <defaults>
</compile_context>

<pallas_src>
import functools

import jax
import jax.numpy as jnp
from jax.experimental import pallas as pl
from jax.experimental.pallas import tpu as pltpu

EPS = 1e-5          # PyTorch F.layer_norm default
LANE = 128


def _cdiv(a, b):
    return -(-a // b)


def _chip_budgets():
    """(max_block_bytes, vmem_limit_bytes, is_v7x) per TPU generation."""
    try:
        kind = jax.devices()[0].device_kind.lower()
    except Exception:
        kind = ""
    if "v7" in kind:
        # 64 MiB physical VMEM: 2x(in+out) double buffers + fp32 temps must fit.
        return 8 * 1024 * 1024, 48 * 1024 * 1024, True
    if "v6" in kind or "v5" in kind or "v4" in kind:
        # 128 MiB physical VMEM.
        return 16 * 1024 * 1024, 100 * 1024 * 1024, False
    # Unknown chip: use v7x-safe numbers.
    return 8 * 1024 * 1024, 48 * 1024 * 1024, False


def _largest_divisor_leq(n, cap):
    cap = max(1, min(n, cap))
    for b in range(cap, 0, -1):
        if n % b == 0:
            return b
    return 1


# ---------------------------------------------------------------------------
# Fused single-pass kernels: whole slab for b_tile batch elements in one block.
# ---------------------------------------------------------------------------
def _ln_fused3d_kernel(x_ref, o_ref, *, inv_n):
    # x_ref: (b_tile, rows, 128), lane-dense, no padding (chw % 128 == 0).
    xf = x_ref[...].astype(jnp.float32)
    # Sublane-first reduce, then a single cross-lane (XLU) reduce per batch elem.
    s_lane = jnp.sum(xf, axis=1)                                     # (b, 128)
    mean = (jnp.sum(s_lane, axis=-1, keepdims=True) * inv_n)[:, :, None]
    d = xf - mean
    v_lane = jnp.sum(d * d, axis=1)                                  # (b, 128)
    var = (jnp.sum(v_lane, axis=-1, keepdims=True) * inv_n)[:, :, None]
    o_ref[...] = (d * jax.lax.rsqrt(var + EPS)).astype(o_ref.dtype)


def _ln_fused2d_kernel(x_ref, o_ref, *, inv_n):
    # x_ref: (b_tile, chw) with chw NOT a multiple of 128.  Keeping the logical
    # shape exact lets Mosaic mask the lane tail in-kernel, so no host-side pad
    # or output slice (no extra HBM passes).
    xf = x_ref[...].astype(jnp.float32)
    mean = jnp.sum(xf, axis=-1, keepdims=True) * inv_n
    d = xf - mean
    var = jnp.sum(d * d, axis=-1, keepdims=True) * inv_n
    o_ref[...] = (d * jax.lax.rsqrt(var + EPS)).astype(o_ref.dtype)


# ---------------------------------------------------------------------------
# Chunked two-pass path (very large C*H*W): pass 1 streams chunks accumulating
# per-lane partial sum / sumsq, pass 2 streams again and normalizes.
# ---------------------------------------------------------------------------
def _ln_stats_kernel(x_ref, stats_ref, sum_acc, sq_acc, *, inv_n):
    j = pl.program_id(1)

    @pl.when(j == 0)
    def _():
        sum_acc[...] = jnp.zeros_like(sum_acc)
        sq_acc[...] = jnp.zeros_like(sq_acc)

    x = x_ref[...].astype(jnp.float32)               # (1, chunk_rows, 128)
    sum_acc[...] += jnp.sum(x, axis=1)               # (1, 128): sublane reduce only
    sq_acc[...] += jnp.sum(x * x, axis=1)

    @pl.when(j == pl.num_programs(1) - 1)
    def _():
        total = jnp.sum(sum_acc[...], axis=1, keepdims=True)      # (1, 1)
        total_sq = jnp.sum(sq_acc[...], axis=1, keepdims=True)
        mean = total * inv_n
        # Streaming form; zero-padding contributes nothing; clamp guards cancellation.
        var = jnp.maximum(total_sq * inv_n - mean * mean, 0.0)
        inv = jax.lax.rsqrt(var + EPS)
        b = sum_acc.shape[0]
        stats = jnp.concatenate([mean, inv], axis=1)              # (1, 2)
        stats_ref[...] = jnp.broadcast_to(stats[:, :, None], (b, 2, LANE))


def _ln_apply_kernel(x_ref, stats_ref, o_ref):
    x = x_ref[...].astype(jnp.float32)               # (1, chunk_rows, 128)
    st = stats_ref[...]                              # (1, 2, 128)
    mean = st[:, 0:1, 0:1]
    inv = st[:, 1:2, 0:1]
    o_ref[...] = ((x - mean) * inv).astype(o_ref.dtype)


# ---------------------------------------------------------------------------
# Wrapper
# ---------------------------------------------------------------------------
def layer_norm_2d(x, *, max_block_bytes=None, vmem_limit_bytes=None):
    """LayerNorm over all non-batch dims of x (NCHW or any rank >= 2)."""
    orig_shape = x.shape
    N = orig_shape[0]
    chw = 1
    for d in orig_shape[1:]:
        chw *= d

    chip_block, chip_vmem, is_v7 = _chip_budgets()
    if max_block_bytes is None:
        max_block_bytes = chip_block
    if vmem_limit_bytes is None:
        vmem_limit_bytes = chip_vmem

    itemsize = jnp.dtype(x.dtype).itemsize
    # Budget the in-kernel fp32 cast temporary for sub-fp32 inputs.
    eff_budget = max_block_bytes if itemsize >= 4 else max_block_bytes // 2
    # Sub-32-bit dtypes pack along sublanes: round row chunks to the packed tile.
    sublane = {4: 8, 2: 16, 1: 32}.get(itemsize, 8)

    lane_aligned = (chw % LANE == 0)
    rows = _cdiv(chw, LANE)
    slab_bytes = chw * itemsize
    inv_n = 1.0 / float(chw)

    params_1d = pltpu.CompilerParams(
        dimension_semantics=("parallel",), vmem_limit_bytes=vmem_limit_bytes)

    # ---------------- single-pass fused path (2 HBM passes) ----------------
    if slab_bytes <= eff_budget and slab_bytes > 0:
        cap = max(1, eff_budget // max(slab_bytes, 1))
        target = min(N, cap)
        if is_v7 and N >= 2:
            # Keep >= 2 grid steps so both v7x TensorCores get work; on single-TC
            # v5e/v6e we instead fill the block budget completely.
            target = min(target, max(1, N // 2))
        b_tile = _largest_divisor_leq(N, target)

        if lane_aligned:
            x3 = x.reshape(N, rows, LANE)            # free reshape, no pad
            out3 = pl.pallas_call(
                functools.partial(_ln_fused3d_kernel, inv_n=inv_n),
                out_shape=jax.ShapeDtypeStruct((N, rows, LANE), x.dtype),
                grid_spec=pltpu.PrefetchScalarGridSpec(
                    num_scalar_prefetch=0,
                    grid=(N // b_tile,),
                    in_specs=[pl.BlockSpec((b_tile, rows, LANE), lambda i: (i, 0, 0))],
                    out_specs=pl.BlockSpec((b_tile, rows, LANE), lambda i: (i, 0, 0)),
                ),
                compiler_params=params_1d,
            )(x3)
            return out3.reshape(orig_shape)

        # chw not a multiple of 128: unpadded 2D slab; sublane block dim must be
        # a multiple of 8 or the full batch dim.
        b2 = None
        if b_tile == N or b_tile % 8 == 0:
            b2 = b_tile
        else:
            for b in range(min(target, N), 0, -1):
                if N % b == 0 and b % 8 == 0:
                    b2 = b
                    break
            if b2 is None and N * slab_bytes <= eff_budget:
                b2 = N                               # corner case: take one step
        if b2 is not None:
            x2 = x.reshape(N, chw)                   # free reshape, no pad
            out2 = pl.pallas_call(
                functools.partial(_ln_fused2d_kernel, inv_n=inv_n),
                out_shape=jax.ShapeDtypeStruct((N, chw), x.dtype),
                grid_spec=pltpu.PrefetchScalarGridSpec(
                    num_scalar_prefetch=0,
                    grid=(N // b2,),
                    in_specs=[pl.BlockSpec((b2, chw), lambda i: (i, 0))],
                    out_specs=pl.BlockSpec((b2, chw), lambda i: (i, 0)),
                ),
                compiler_params=params_1d,
            )(x2)
            return out2.reshape(orig_shape)
        # else: fall through to the padded chunked path (rare corner case).

    # ---------------- chunked two-pass path (large C*H*W) ----------------
    params_stats = pltpu.CompilerParams(
        dimension_semantics=("parallel", "arbitrary"),
        vmem_limit_bytes=vmem_limit_bytes)
    # Pass 2 has no cross-chunk carry -> both grid axes are parallel (v7x megacore
    # stays busy even for N=1..2).
    params_apply = pltpu.CompilerParams(
        dimension_semantics=("parallel", "parallel"),
        vmem_limit_bytes=vmem_limit_bytes)

    chunk_budget = max(LANE * itemsize * sublane, eff_budget // 2)
    max_chunk_rows = max(sublane,
                         (chunk_budget // (LANE * itemsize)) // sublane * sublane)
    n_chunks = _cdiv(rows, max_chunk_rows)
    chunk_rows = _cdiv(_cdiv(rows, n_chunks), sublane) * sublane
    padded_rows = chunk_rows * n_chunks
    padded_chw = padded_rows * LANE

    x2 = x.reshape(N, chw)
    if padded_chw != chw:
        # Host pad only in this fallback; zero rows contribute nothing to sum/sumsq.
        x2 = jnp.pad(x2, ((0, 0), (0, padded_chw - chw)))
    x3 = x2.reshape(N, padded_rows, LANE)

    # Pass 1: per-batch (mean, rstd), accumulated across chunks.
    stats = pl.pallas_call(
        functools.partial(_ln_stats_kernel, inv_n=inv_n),
        out_shape=jax.ShapeDtypeStruct((N, 2, LANE), jnp.float32),
        grid_spec=pltpu.PrefetchScalarGridSpec(
            num_scalar_prefetch=0,
            grid=(N, n_chunks),
            in_specs=[pl.BlockSpec((1, chunk_rows, LANE), lambda i, j: (i, j, 0))],
            out_specs=pl.BlockSpec((1, 2, LANE), lambda i, j: (i, 0, 0)),
            scratch_shapes=[pltpu.VMEM((1, LANE), jnp.float32),
                            pltpu.VMEM((1, LANE), jnp.float32)],
        ),
        compiler_params=params_stats,
    )(x3)

    # Pass 2: stream chunks again and normalize.
    out3 = pl.pallas_call(
        _ln_apply_kernel,
        out_shape=jax.ShapeDtypeStruct((N, padded_rows, LANE), x.dtype),
        grid_spec=pltpu.PrefetchScalarGridSpec(
            num_scalar_prefetch=0,
            grid=(N, n_chunks),
            in_specs=[pl.BlockSpec((1, chunk_rows, LANE), lambda i, j: (i, j, 0)),
                      pl.BlockSpec((1, 2, LANE), lambda i, j: (i, 0, 0))],
            out_specs=pl.BlockSpec((1, chunk_rows, LANE), lambda i, j: (i, j, 0)),
        ),
        compiler_params=params_apply,
    )(x3, stats)

    out2 = out3.reshape(N, padded_chw)
    if padded_chw != chw:
        out2 = out2[:, :chw]
    return out2.reshape(orig_shape)


def layer_norm_2d_ref(x):
    """Pure-JAX reference matching F.layer_norm(x, x.shape[1:])."""
    xf = x.astype(jnp.float32)
    axes = tuple(range(1, x.ndim))
    mean = jnp.mean(xf, axis=axes, keepdims=True)
    var = jnp.mean((xf - mean) ** 2, axis=axes, keepdims=True)
    return ((xf - mean) * jax.lax.rsqrt(var + EPS)).astype(x.dtype)


if __name__ == "__main__":
    key = jax.random.PRNGKey(0)
    k1, k2, k3 = jax.random.split(key, 3)

    # 1) Module-sized test (fused lane-dense path): (N, C, H, W) = (2, 4, 16, 16).
    x = jax.random.normal(k1, (2, 4, 16, 16), dtype=jnp.float32)
    out = jax.block_until_ready(layer_norm_2d(x))
    ref = layer_norm_2d_ref(x)
    assert out.shape == x.shape and out.dtype == x.dtype
    assert jnp.allclose(out, ref, atol=1e-4, rtol=1e-4), "fused path mismatch"

    # 2) Exercise the chunked two-pass path (forced via a tiny block budget).
    x2 = jax.random.normal(k2, (2, 8, 32, 32), dtype=jnp.float32)
    out2 = jax.block_until_ready(layer_norm_2d(x2, max_block_bytes=16 * 1024))
    ref2 = layer_norm_2d_ref(x2)
    assert jnp.allclose(out2, ref2, atol=1e-4, rtol=1e-4), "chunked path mismatch"

    # 3) Exercise the unpadded lane-tail path (C*H*W not a multiple of 128).
    x3 = jax.random.normal(k3, (2, 3, 5, 7), dtype=jnp.float32)
    out3 = jax.block_until_ready(layer_norm_2d(x3))
    ref3 = layer_norm_2d_ref(x3)
    assert jnp.allclose(out3, ref3, atol=1e-4, rtol=1e-4), "lane-tail path mismatch"

    print("KERNEL_OK")
</pallas_src>

<mosaic_0001>
module attributes {stable_mosaic.version = 11 : i64} {
  func.func @_ln_fused3d_kernel(%arg0: i32, %arg1: memref<2x8x128xf32, #tpu.memory_space<vmem>>, %arg2: memref<2x8x128xf32, #tpu.memory_space<vmem>>) attributes {dimension_semantics = [#tpu.dimension_semantics<parallel>], iteration_bounds = array<i64: 1>, scalar_prefetch = 0 : i64, scratch_operands = 0 : i64, tpu.core_type = #tpu.core_type<tc>, window_params = [{transform_indices = @transform_0, window_bounds = array<i64: 2, 8, 128>}, {transform_indices = @transform_1, window_bounds = array<i64: 2, 8, 128>}]} {
    %c0 = arith.constant 0 : index
    %c0_0 = arith.constant 0 : index
    %c0_1 = arith.constant 0 : index
    %0 = vector.load %arg1[%c0, %c0_0, %c0_1] : memref<2x8x128xf32, #tpu.memory_space<vmem>>, vector<2x8x128xf32>
    %cst = arith.constant dense<0.000000e+00> : vector<2x128xf32>
    %1 = vector.multi_reduction <add>, %0, %cst [1] : vector<2x8x128xf32> to vector<2x128xf32>
    %cst_2 = arith.constant dense<0.000000e+00> : vector<2xf32>
    %2 = vector.multi_reduction <add>, %1, %cst_2 [1] : vector<2x128xf32> to vector<2xf32>
    %3 = vector.shape_cast %2 : vector<2xf32> to vector<2x1xf32>
    %cst_3 = arith.constant 9.765625E-4 : f32
    %4 = vector.broadcast %cst_3 : f32 to vector<2x1xf32>
    %5 = arith.mulf %3, %4 : vector<2x1xf32>
    %6 = vector.shape_cast %5 : vector<2x1xf32> to vector<2x1x1xf32>
    %7 = vector.broadcast %6 : vector<2x1x1xf32> to vector<2x8x128xf32>
    %8 = arith.subf %0, %7 : vector<2x8x128xf32>
    %9 = arith.mulf %8, %8 : vector<2x8x128xf32>
    %cst_4 = arith.constant dense<0.000000e+00> : vector<2x128xf32>
    %10 = vector.multi_reduction <add>, %9, %cst_4 [1] : vector<2x8x128xf32> to vector<2x128xf32>
    %cst_5 = arith.constant dense<0.000000e+00> : vector<2xf32>
    %11 = vector.multi_reduction <add>, %10, %cst_5 [1] : vector<2x128xf32> to vector<2xf32>
    %12 = vector.shape_cast %11 : vector<2xf32> to vector<2x1xf32>
    %cst_6 = arith.constant 9.765625E-4 : f32
    %13 = vector.broadcast %cst_6 : f32 to vector<2x1xf32>
    %14 = arith.mulf %12, %13 : vector<2x1xf32>
    %15 = vector.shape_cast %14 : vector<2x1xf32> to vector<2x1x1xf32>
    %cst_7 = arith.constant 9.99999974E-6 : f32
    %16 = vector.broadcast %cst_7 : f32 to vector<2x1x1xf32>
    %17 = arith.addf %15, %16 : vector<2x1x1xf32>
    %18 = math.rsqrt %17 : vector<2x1x1xf32>
    %19 = vector.broadcast %18 : vector<2x1x1xf32> to vector<2x8x128xf32>
    %20 = arith.mulf %8, %19 : vector<2x8x128xf32>
    %c0_8 = arith.constant 0 : index
    %c0_9 = arith.constant 0 : index
    %c0_10 = arith.constant 0 : index
    %21 = vector.load %arg2[%c0_8, %c0_9, %c0_10] : memref<2x8x128xf32, #tpu.memory_space<vmem>>, vector<2x8x128xf32>
    tpu.vector_store %arg2[%c0_8, %c0_9, %c0_10], %20 {strides = array<i32>} : memref<2x8x128xf32, #tpu.memory_space<vmem>>, vector<2x8x128xf32>,
    return
  }
  func.func @transform_0(%arg0: i32) -> (i32, i32, i32) {
    %c0_i32 = arith.constant 0 : i32
    %c0_i32_0 = arith.constant 0 : i32
    %c0_i32_1 = arith.constant 0 : i32
    return %arg0, %c0_i32, %c0_i32_0 : i32, i32, i32
  }
  func.func @transform_1(%arg0: i32) -> (i32, i32, i32) {
    %c0_i32 = arith.constant 0 : i32
    %c0_i32_0 = arith.constant 0 : i32
    %c0_i32_1 = arith.constant 0 : i32
    return %arg0, %c0_i32, %c0_i32_0 : i32, i32, i32
  }
}

</mosaic_0001>

<bundles_post_ra>
// kernel: tpu_custom_call.1
= control target key start
LH: loop header
LB: loop body
LE: loop exit
PB: predicated region body
PF: predicated region fallthrough
CT: control target
= control target key end

     0   :  { %6 = vsyncpa [#allocation3], 0  ;;  %s200_s0 = inlined_call_operand.hbm [shape: f32[2,8,128], index: 0, kind: input, shape index: {}]   ;;  %s201_s1 = inlined_call_operand.hbm [shape: f32[2,8,128], index: 1, kind: output, shape index: {}]  }
   0x1   :  { %7 = vsyncpa [#allocation4], 0  ;;  %s170_s6 = smov [#allocation2]  }
   0x2   :  { %s13_s7 = sshll.u32 %s170_s6, 4  ;;  %s14_s7 = int_to_ptr.vmem [resolvable:$true] %s13_s7 }
   0x3   :  { %s134_s8 = scalar_lea.vmem %s14_s7, 256  ;;  %p139_p1 = scmp.lt.s32.totalorder %s14_s7, %s14_s7 }
   0x4   :  { %p135_p0 = scmp.ne.s32.totalorder %s14_s7, %s134_s8  ;;  %p140_p2 = scmp.lt.s32.totalorder %s134_s8, %s134_s8 }
   0x6   :  { %p141_p3 = por %p140_p2, %p139_p1 }
   0x8   :  { %p142_p4 = pnand %p141_p3, %p135_p0 }
   0xa   :  { %145 = shalt.err (!%p142_p4)
}
   0xb   :  { %s171_s9 = smov 128   ;;  %s172_s10 = smov 8  }
   0xc   :  { %19 = dma.hbm_to_vmem [thread:$0]  %s200_s0, 256, %s14_s7, [#allocation3], %s171_s9, %s171_s9, %s172_s10  }
   0xd   :  { %166 = dma.done.wait [#allocation3], 256  }
   0xe   :  { %167 = vsyncadd [#allocation3], 4294967040  ;;  %v23_v0 = vld [vmem:[#allocation2] sm:$0xff]  ;;  %v24_v1 = vld [vmem:[#allocation2 + $0x8] sm:$0xff]  ;;  %vm39_vm0 = vcmask 1041409   ;;  %vm42_vm1 = vcmask 1041408   ;;  %v48_v16 = vlaneseq }
   0xf   :  { %v25_v2 = vrot.slane %v23_v0, 4  ;;  %v31_v3 = vrot.slane %v24_v1, 4  ;;  %s173_s0 = smov [#allocation5]  }
  0x10   :  { %v49_v17 = vshrl.u32 %v48_v16, 7  ;;  %s106_s13 = sshll.u32 %s173_s0, 4  ;;  %s107_s13 = int_to_ptr.vmem [resolvable:$true] %s106_s13 }
  0x11   :  { %v26_v4 = vadd.f32 %v25_v2, %v23_v0  ;;  %v32_v5 = vadd.f32 %v31_v3, %v24_v1  ;;  %s146_s14 = scalar_lea.vmem %s107_s13, 256  ;;  %p151_p6 = scmp.lt.s32.totalorder %s107_s13, %s107_s13 }
  0x12   :  { %v50_v18 = vsub.s32 0, %v49_v17  ;;  %v54_v19 = vsub.s32 1, %v49_v17  ;;  %p147_p5 = scmp.ne.s32.totalorder %s107_s13, %s146_s14  ;;  %p152_p7 = scmp.lt.s32.totalorder %s146_s14, %s146_s14 }
  0x13   :  { %v27_v6 = vrot.slane %v26_v4, 2  ;;  %v33_v7 = vrot.slane %v32_v5, 2 }
  0x14   :  { %p153_p8 = por %p152_p7, %p151_p6 }
  0x15   :  { %v28_v8 = vadd.f32 %v27_v6, %v26_v4  ;;  %v34_v9 = vadd.f32 %v33_v7, %v32_v5 }
  0x16   :  { %p154_p9 = pnand %p153_p8, %p147_p5 }
  0x17   :  { %v29_v10 = vrot.slane %v28_v8, 1  ;;  %v35_v11 = vrot.slane %v34_v9, 1 }
  0x19   :  { %v30_v12 = vadd.f32 %v29_v10, %v28_v8  ;;  %v36_v13 = vadd.f32 %v35_v11, %v34_v9 }
  0x1b   :  { %v40_v14 = vsel %vm39_vm0, %v36_v13, %v30_v12 }
  0x1c   :  { %v43_v15 = vsel %vm42_vm1, %v40_v14, 0.0 }
  0x1d   :  { %44 = vadd.xlane.f32.xlu0 %v43_v15 }
  0xa6   :  { %v45_v20 = vpop.xlane.xlu0 %44 }
  0xa7   :  { %v46_v21 = vmul.f32 0.0009765625, %v45_v20 }
  0xa9   :  { %v51_v22 = vrot.slane %v46_v21, %v50_v18  ;;  %v55_v23 = vrot.slane %v46_v21, %v54_v19 }
  0xab   :  { %v58_v24 = vsub.f32 %v23_v0, %v51_v22  ;;  %v59_v25 = vsub.f32 %v24_v1, %v55_v23 }
  0xad   :  { %v60_v26 = vmul.f32 %v58_v24, %v58_v24  ;;  %v61_v27 = vmul.f32 %v59_v25, %v59_v25 }
  0xaf   :  { %v62_v28 = vrot.slane %v60_v26, 4  ;;  %v68_v29 = vrot.slane %v61_v27, 4 }
  0xb1   :  { %v63_v30 = vadd.f32 %v62_v28, %v60_v26  ;;  %v69_v31 = vadd.f32 %v68_v29, %v61_v27 }
  0xb3   :  { %v64_v32 = vrot.slane %v63_v30, 2  ;;  %v70_v33 = vrot.slane %v69_v31, 2 }
  0xb5   :  { %v65_v34 = vadd.f32 %v64_v32, %v63_v30  ;;  %v71_v35 = vadd.f32 %v70_v33, %v69_v31 }
  0xb7   :  { %v66_v36 = vrot.slane %v65_v34, 1  ;;  %v72_v37 = vrot.slane %v71_v35, 1 }
  0xb9   :  { %v67_v38 = vadd.f32 %v66_v36, %v65_v34  ;;  %v73_v39 = vadd.f32 %v72_v37, %v71_v35 }
  0xbb   :  { %v76_v40 = vsel %vm39_vm0, %v73_v39, %v67_v38 }
  0xbc   :  { %v78_v41 = vsel %vm42_vm1, %v76_v40, 0.0 }
  0xbd   :  { %79 = vadd.xlane.f32.xlu0 %v78_v41 }
 0x146   :  { %v80_v42 = vpop.xlane.xlu0 %79 }
 0x147   :  { %v81_v43 = vmul.f32 0.0009765625, %v80_v42 }
 0x149   :  { %v86_v44 = vrot.slane %v81_v43, %v50_v18  ;;  %v90_v45 = vrot.slane %v81_v43, %v54_v19 }
 0x14b   :  { %v93_v46 = vadd.f32 1e-05, %v86_v44  ;;  %v94_v47 = vadd.f32 1e-05, %v90_v45 }
 0x14d   :  { %122 = vrsqrt.f32 %v93_v46 }
 0x14e   :  { %124 = vrsqrt.f32 %v94_v47 }
 0x15a   :  { %v123_v48 = vpop.eup %122 }
 0x15b   :  { %v125_v49 = vpop.eup %124  ;;  %v97_v50 = vmul.f32 %v123_v48, %v58_v24 }
 0x15c   :  { %v98_v51 = vmul.f32 %v125_v49, %v59_v25 }
 0x15d   :  { %99 = vst [vmem:[#allocation5] sm:$0xff] %v97_v50 }
 0x15e   :  { %100 = vst [vmem:[#allocation5 + $0x8] sm:$0xff] %v98_v51 }
 0x15f   :  { %157 = shalt.err (!%p154_p9)
}
 0x160   :  { %112 = dma.vmem_to_hbm [thread:$0]  %s107_s13, 256, %s201_s1, [#allocation4], %s171_s9, %s171_s9, %s172_s10  }
 0x161   :  { %168 = dma.done.wait [#allocation4], 256  }
 0x162   :  { %169 = vsyncadd [#allocation4], 4294967040 }
 0x163   :  { %116 = vsyncpa [#allocation3], 1 }
 0x164   :  { %117 = vsyncpa [#allocation4], 1 }

</bundles_post_ra>
